<compile_context>
chip_gen: v6e
topology: v6e:2x2x1
jax: 0.10.0
libtpu: 0.0.40
codegen_flags: <defaults>
</compile_context>

<pallas_src>
import functools

import jax
import jax.numpy as jnp
import numpy as np
from jax.experimental import pallas as pl
from jax.experimental.pallas import tpu as pltpu


def autopad(k, p=None, d=1):
    """Pad to 'same' shape outputs (mirrors the PyTorch helper)."""
    if d > 1:
        k = d * (k - 1) + 1 if isinstance(k, int) else [d * (x - 1) + 1 for x in k]
    if p is None:
        p = k // 2 if isinstance(k, int) else [x // 2 for x in k]
    return p


def _conv_bn_act_kernel(x_ref, w_ref, b_ref, o_ref, *,
                        KH, KW, stride, dil, OH, OW, apply_act):
    """One batch element: NHWC conv (BN pre-folded into w/b) + optional SiLU.

    x_ref: (Hp, Wp, Cin)   spatially pre-padded input, channels-last
    w_ref: (KH, KW, Cin, Cout)  BN-folded weights
    b_ref: (1, Cout)            BN-folded bias = beta - mean * gamma / sqrt(var + eps)
    o_ref: (OH, OW, Cout)
    """
    x = x_ref[...]
    cin = x.shape[-1]
    cout = o_ref.shape[-1]

    acc = jnp.zeros((OH * OW, cout), jnp.float32)
    for kh in range(KH):          # static unrolled loops over the kernel taps
        for kw in range(KW):
            h0 = kh * dil
            w0 = kw * dil
            patch = x[h0:h0 + (OH - 1) * stride + 1:stride,
                      w0:w0 + (OW - 1) * stride + 1:stride, :]      # (OH, OW, Cin)
            acc = acc + jnp.dot(patch.reshape(OH * OW, cin), w_ref[kh, kw],
                                preferred_element_type=jnp.float32)

    acc = acc + b_ref[...]                                          # (1, Cout) broadcast
    if apply_act:
        acc = acc * (1.0 / (1.0 + jnp.exp(-acc)))                   # SiLU = x * sigmoid(x)
    o_ref[...] = acc.reshape(OH, OW, cout).astype(o_ref.dtype)


def conv_bn_act(x, conv_w, bn_w, bn_b, bn_mean, bn_var, *,
                stride=1, padding=None, dilation=1, groups=1,
                eps=1e-5, act=True):
    """Forward of ultralytics Conv: act(bn(conv(x))) with inference-mode BN, NCHW in/out."""
    if groups != 1:
        raise NotImplementedError("TODO(synk): grouped conv (g>1) not implemented")

    N, Cin, H, W = x.shape
    Cout, Cin_w, KH, KW = conv_w.shape
    assert Cin_w == Cin, "channel mismatch"

    pad = autopad([KH, KW], padding, dilation)
    if isinstance(pad, int):
        ph = pw = pad
    else:
        ph, pw = pad

    # ---- Fold inference-mode BatchNorm into the conv weights / bias (f32). ----
    inv_std = 1.0 / jnp.sqrt(bn_var.astype(jnp.float32) + eps)
    scale = bn_w.astype(jnp.float32) * inv_std                          # (Cout,)
    shift = bn_b.astype(jnp.float32) - bn_mean.astype(jnp.float32) * scale
    w_f = conv_w.astype(jnp.float32) * scale[:, None, None, None]       # OIHW, scaled
    w_f = jnp.transpose(w_f, (2, 3, 1, 0))                              # (KH, KW, Cin, Cout)
    b_f = shift.reshape(1, Cout)

    # ---- Channels-last (lane-dense) layout + spatial zero pre-padding. ----
    x_nhwc = jnp.transpose(x, (0, 2, 3, 1))
    x_pad = jnp.pad(x_nhwc, ((0, 0), (ph, ph), (pw, pw), (0, 0)))
    Hp, Wp = H + 2 * ph, W + 2 * pw
    OH = (Hp - dilation * (KH - 1) - 1) // stride + 1
    OW = (Wp - dilation * (KW - 1) - 1) // stride + 1

    kernel = functools.partial(_conv_bn_act_kernel, KH=KH, KW=KW,
                               stride=stride, dil=dilation, OH=OH, OW=OW,
                               apply_act=bool(act))

    out_nhwc = pl.pallas_call(
        kernel,
        out_shape=jax.ShapeDtypeStruct((N, OH, OW, Cout), x.dtype),
        grid=(N,),
        in_specs=[
            pl.BlockSpec((None, Hp, Wp, Cin), lambda n: (n, 0, 0, 0)),   # one image / step
            pl.BlockSpec((KH, KW, Cin, Cout), lambda n: (0, 0, 0, 0)),   # folded weights
            pl.BlockSpec((1, Cout), lambda n: (0, 0)),                   # folded bias (VMEM)
        ],
        out_specs=pl.BlockSpec((None, OH, OW, Cout), lambda n: (n, 0, 0, 0)),
        compiler_params=pltpu.CompilerParams(
            dimension_semantics=("parallel",),
            vmem_limit_bytes=32 * 1024 * 1024),
    )(x_pad, w_f, b_f)

    return jnp.transpose(out_nhwc, (0, 3, 1, 2))                         # back to NCHW


if __name__ == "__main__":
    # Small deterministic example consistent with Conv(c1=4, c2=8, k, s=1, act=True)
    N, C1, H, W = 2, 4, 16, 16
    C2 = 8
    eps = 1e-5

    key = jax.random.PRNGKey(0)
    keys = jax.random.split(key, 8)

    x = jax.random.normal(keys[0], (N, C1, H, W), dtype=jnp.float32)
    bn_w = jax.random.uniform(keys[1], (C2,), dtype=jnp.float32, minval=0.5, maxval=1.5)
    bn_b = jax.random.normal(keys[2], (C2,), dtype=jnp.float32)
    bn_mean = jax.random.normal(keys[3], (C2,), dtype=jnp.float32)
    bn_var = jax.random.uniform(keys[4], (C2,), dtype=jnp.float32, minval=0.5, maxval=1.5)

    def reference(x, w, k, s, d, g, act):
        p = autopad(k, None, d)
        y = jax.lax.conv_general_dilated(
            x, w, window_strides=(s, s), padding=((p, p), (p, p)),
            rhs_dilation=(d, d),
            dimension_numbers=("NCHW", "OIHW", "NCHW"),
            feature_group_count=g,
            precision=jax.lax.Precision.HIGHEST)
        inv = 1.0 / jnp.sqrt(bn_var + eps)
        sc = bn_w * inv
        sh = bn_b - bn_mean * sc
        y = y * sc[None, :, None, None] + sh[None, :, None, None]
        if act:
            y = y * jax.nn.sigmoid(y)
        return y

    # Exercise the default 1x1 conv and a typical 3x3 'same' conv.
    for k_sz, wkey in ((1, keys[5]), (3, keys[6])):
        conv_w = jax.random.normal(wkey, (C2, C1, k_sz, k_sz), dtype=jnp.float32) * 0.2
        out = conv_bn_act(x, conv_w, bn_w, bn_b, bn_mean, bn_var,
                          stride=1, padding=None, dilation=1, groups=1,
                          eps=eps, act=True)
        out = jax.block_until_ready(out)
        ref = reference(x, conv_w, k_sz, 1, 1, 1, True)
        np.testing.assert_allclose(np.asarray(out), np.asarray(ref),
                                   rtol=5e-4, atol=5e-4)

    print("KERNEL_OK")
</pallas_src>

<mosaic_0001>
module attributes {stable_mosaic.version = 11 : i64} {
  func.func @_conv_bn_act_kernel(%arg0: i32, %arg1: memref<1x16x16x4xf32, #tpu.memory_space<vmem>>, %arg2: memref<1x1x4x8xf32, #tpu.memory_space<vmem>>, %arg3: memref<1x8xf32, #tpu.memory_space<vmem>>, %arg4: memref<1x16x16x8xf32, #tpu.memory_space<vmem>>) attributes {dimension_semantics = [#tpu.dimension_semantics<parallel>], iteration_bounds = array<i64: 2>, scalar_prefetch = 0 : i64, scratch_operands = 0 : i64, tpu.core_type = #tpu.core_type<tc>, window_params = [{transform_indices = @transform_0, window_bounds = array<i64: 1, 16, 16, 4>}, {pipeline_mode = #tpu.pipeline_mode<synchronous>, transform_indices = @transform_1, window_bounds = array<i64: 1, 1, 4, 8>}, {pipeline_mode = #tpu.pipeline_mode<synchronous>, transform_indices = @transform_2, window_bounds = array<i64: 1, 8>}, {transform_indices = @transform_3, window_bounds = array<i64: 1, 16, 16, 8>}]} {
    %c0 = arith.constant 0 : index
    %c0_0 = arith.constant 0 : index
    %c0_1 = arith.constant 0 : index
    %c0_2 = arith.constant 0 : index
    %0 = vector.load %arg1[%c0, %c0_0, %c0_1, %c0_2] : memref<1x16x16x4xf32, #tpu.memory_space<vmem>>, vector<1x16x16x4xf32>
    %1 = vector.shape_cast %0 : vector<1x16x16x4xf32> to vector<16x16x4xf32>
    %cst = arith.constant 0.000000e+00 : f32
    %2 = vector.broadcast %cst : f32 to vector<256x8xf32>
    %3 = vector.shape_cast %1 : vector<16x16x4xf32> to vector<256x4xf32>
    %c0_3 = arith.constant 0 : index
    %c0_4 = arith.constant 0 : index
    %c0_5 = arith.constant 0 : index
    %c0_6 = arith.constant 0 : index
    %4 = vector.load %arg2[%c0_3, %c0_4, %c0_5, %c0_6] : memref<1x1x4x8xf32, #tpu.memory_space<vmem>>, vector<1x1x4x8xf32>
    %5 = vector.shape_cast %4 : vector<1x1x4x8xf32> to vector<4x8xf32>
    %cst_7 = arith.constant dense<0.000000e+00> : vector<256x8xf32>
    %6 = tpu.matmul %3, %5, %cst_7 {dimension_numbers = #tpu.dot_dimension_numbers<[1], [0], [0], [1], [0, 0, 1, 1], [], []>} : vector<256x4xf32>, vector<4x8xf32>, vector<256x8xf32> -> vector<256x8xf32>
    %7 = arith.addf %2, %6 : vector<256x8xf32>
    %c0_8 = arith.constant 0 : index
    %c0_9 = arith.constant 0 : index
    %8 = vector.load %arg3[%c0_8, %c0_9] : memref<1x8xf32, #tpu.memory_space<vmem>>, vector<1x8xf32>
    %9 = vector.broadcast %8 : vector<1x8xf32> to vector<256x8xf32>
    %10 = arith.addf %7, %9 : vector<256x8xf32>
    %cst_10 = arith.constant 0.000000e+00 : f32
    %11 = vector.broadcast %cst_10 : f32 to vector<256x8xf32>
    %12 = arith.subf %11, %10 : vector<256x8xf32>
    %13 = math.exp %12 : vector<256x8xf32>
    %cst_11 = arith.constant 1.000000e+00 : f32
    %14 = vector.broadcast %cst_11 : f32 to vector<256x8xf32>
    %15 = arith.addf %14, %13 : vector<256x8xf32>
    %cst_12 = arith.constant 1.000000e+00 : f32
    %16 = vector.broadcast %cst_12 : f32 to vector<256x8xf32>
    %17 = arith.divf %16, %15 : vector<256x8xf32>
    %18 = arith.mulf %10, %17 : vector<256x8xf32>
    %19 = vector.shape_cast %18 : vector<256x8xf32> to vector<16x16x8xf32>
    %c0_13 = arith.constant 0 : index
    %c0_14 = arith.constant 0 : index
    %c0_15 = arith.constant 0 : index
    %c0_16 = arith.constant 0 : index
    %20 = vector.load %arg4[%c0_13, %c0_14, %c0_15, %c0_16] : memref<1x16x16x8xf32, #tpu.memory_space<vmem>>, vector<1x16x16x8xf32>
    %21 = vector.shape_cast %20 : vector<1x16x16x8xf32> to vector<16x16x8xf32>
    %22 = vector.shape_cast %19 : vector<16x16x8xf32> to vector<1x16x16x8xf32>
    tpu.vector_store %arg4[%c0_13, %c0_14, %c0_15, %c0_16], %22 {strides = array<i32>} : memref<1x16x16x8xf32, #tpu.memory_space<vmem>>, vector<1x16x16x8xf32>,
    return
  }
  func.func @transform_0(%arg0: i32) -> (i32, i32, i32, i32) {
    %c0_i32 = arith.constant 0 : i32
    %c0_i32_0 = arith.constant 0 : i32
    %c0_i32_1 = arith.constant 0 : i32
    %c0_i32_2 = arith.constant 0 : i32
    return %arg0, %c0_i32, %c0_i32_0, %c0_i32_1 : i32, i32, i32, i32
  }
  func.func @transform_1(%arg0: i32) -> (i32, i32, i32, i32) {
    %c0_i32 = arith.constant 0 : i32
    %c0_i32_0 = arith.constant 0 : i32
    %c0_i32_1 = arith.constant 0 : i32
    %c0_i32_2 = arith.constant 0 : i32
    %c0_i32_3 = arith.constant 0 : i32
    return %c0_i32, %c0_i32_0, %c0_i32_1, %c0_i32_2 : i32, i32, i32, i32
  }
  func.func @transform_2(%arg0: i32) -> (i32, i32) {
    %c0_i32 = arith.constant 0 : i32
    %c0_i32_0 = arith.constant 0 : i32
    %c0_i32_1 = arith.constant 0 : i32
    return %c0_i32, %c0_i32_0 : i32, i32
  }
  func.func @transform_3(%arg0: i32) -> (i32, i32, i32, i32) {
    %c0_i32 = arith.constant 0 : i32
    %c0_i32_0 = arith.constant 0 : i32
    %c0_i32_1 = arith.constant 0 : i32
    %c0_i32_2 = arith.constant 0 : i32
    return %arg0, %c0_i32, %c0_i32_0, %c0_i32_1 : i32, i32, i32, i32
  }
}

</mosaic_0001>

<bundles_post_ra>
// kernel: tpu_custom_call.1
= control target key start
LH: loop header
LB: loop body
LE: loop exit
PB: predicated region body
PF: predicated region fallthrough
CT: control target
= control target key end

     0   :  { %s1145_s12 = smov 0   ;;  %s1469_s0 = inlined_call_operand.vmem [shape: f32[2,16,16,4], index: 0, kind: input, shape index: {}]   ;;  %s1470_s1 = inlined_call_operand.vmem [shape: f32[1,1,4,8], index: 1, kind: input, shape index: {}]   ;;  %s1471_s2 = inlined_call_operand.vmem [shape: f32[1,8], index: 2, kind: input, shape index: {}]   ;;  %s1472_s3 = inlined_call_operand.vmem [shape: f32[2,16,16,8], index: 3, kind: output, shape index: {}]  }
   0x1 LB: > { %s849_s13 = sadd.s32 4294967295, %s1123_s12   ;;  %p853_p0 = scmp.ge.s32.totalorder %s1123_s12, 1  ;;  %s1123_s12 = sphi %s1145_s12, %s13_s12  }
   0x2   : > { %p137_p1 = scmp.lt.s32.totalorder %s1123_s12, 3 }
   0x4   : > { %p138_p2 = pnand %p853_p0, %p137_p1 }
   0x5   : > { %p161_p3 = scmp.lt.s32.totalorder (!%p138_p2), %s849_s13, 1 }
   0x6   : > { %141 = sbr.rel (%p138_p2) target bundleno = 300 (0x12c), region = 32 }
   0xb   : > { %v203_v0 = vld [vmem:[%s1470_s1] sm:$0xf]  ;;  %vm308_vm0 = vcmask 1043456   ;;  %s1474_s13 = smov (!%p161_p3, %s849_s13), 1  ;;  %vm211_vm1 = vcmask 31744   ;;  %vm761_vm2 = vcmask 64512  }
   0xc   : > { %929 = vmatprep.subr.msk.mxu0 %vm308_vm0, %v203_v0  ;;  %979 = vmatprep.subr.msk.mxu1 %vm308_vm0, %v203_v0  ;;  %s894_s16 = sshll.u32 %s1474_s13, 8  ;;  %v1233_v33 = vld [vmem:[%s1471_s2] ss:$0 sm:$0xff] }
   0xd   : > { %930 = vmatpush3.msk.msra.mxu0 %vm308_vm0, %v203_v0  ;;  %980 = vmatpush3.msk.msra.mxu1 %vm308_vm0, %v203_v0  ;;  %s1164_s19 = scalar_lea.vmem %s1469_s0, %s894_s16  ;;  %s1335_s24 = scalar_lea.vmem %s1472_s3, %s894_s16 }
   0xe   : > { %v171_v1 = vld [vmem:[%s1164_s19] sm:$0xff]  ;;  %v172_v3 = vld [vmem:[%s1164_s19 + $0x8] sm:$0xff]  ;;  %v173_v5 = vld [vmem:[%s1164_s19 + $0x10] sm:$0xff] }
   0xf   : > { %v187_v2 = vld [vmem:[%s1164_s19 + $0x80] sm:$0xff]  ;;  %931 = vmatprep.mubr.msk.f32.mxu0 %vm211_vm1, %v171_v1  ;;  %v188_v4 = vld [vmem:[%s1164_s19 + $0x88] sm:$0xff]  ;;  %v189_v6 = vld [vmem:[%s1164_s19 + $0x90] sm:$0xff] }
  0x10   : > { %955 = vmatprep.mubr.msk.f32.mxu1 %vm211_vm1, %v187_v2  ;;  %932 = vmatmul.mubr.msk.f32.vlgmr.msra.gmra.mxu0 %vm211_vm1, %v172_v3  ;;  %v174_v7 = vld [vmem:[%s1164_s19 + $0x18] sm:$0xff]  ;;  %v175_v9 = vld [vmem:[%s1164_s19 + $0x20] sm:$0xff]  ;;  %v176_v11 = vld [vmem:[%s1164_s19 + $0x28] sm:$0xff] }
  0x11   : > { %956 = vmatmul.mubr.msk.f32.vlgmr.msra.gmra.mxu1 %vm211_vm1, %v188_v4  ;;  %934 = vmatprep.mubr.msk.f32.mxu0 %vm211_vm1, %v173_v5  ;;  %v190_v8 = vld [vmem:[%s1164_s19 + $0x98] sm:$0xff]  ;;  %v191_v10 = vld [vmem:[%s1164_s19 + $0xa0] sm:$0xff]  ;;  %v192_v12 = vld [vmem:[%s1164_s19 + $0xa8] sm:$0xff] }
  0x12   : > { %958 = vmatprep.mubr.msk.f32.mxu1 %vm211_vm1, %v189_v6  ;;  %v177_v13 = vld [vmem:[%s1164_s19 + $0x30] sm:$0xff]  ;;  %v178_v15 = vld [vmem:[%s1164_s19 + $0x38] sm:$0xff]  ;;  %v179_v17 = vld [vmem:[%s1164_s19 + $0x40] sm:$0xff] }
  0x13   : > { %v193_v14 = vld [vmem:[%s1164_s19 + $0xb0] sm:$0xff]  ;;  %v194_v16 = vld [vmem:[%s1164_s19 + $0xb8] sm:$0xff]  ;;  %v195_v18 = vld [vmem:[%s1164_s19 + $0xc0] sm:$0xff] }
  0x14   : > { %935 = vmatmul.mubr.msk.f32.gmra.mxu0 %vm211_vm1, %v174_v7  ;;  %v180_v19 = vld [vmem:[%s1164_s19 + $0x48] sm:$0xff]  ;;  %v181_v21 = vld [vmem:[%s1164_s19 + $0x50] sm:$0xff]  ;;  %v182_v23 = vld [vmem:[%s1164_s19 + $0x58] sm:$0xff] }
  0x15   : > { %959 = vmatmul.mubr.msk.f32.gmra.mxu1 %vm211_vm1, %v190_v8  ;;  %937 = vmatprep.mubr.msk.f32.mxu0 %vm211_vm1, %v175_v9  ;;  %v196_v20 = vld [vmem:[%s1164_s19 + $0xc8] sm:$0xff]  ;;  %v197_v22 = vld [vmem:[%s1164_s19 + $0xd0] sm:$0xff]  ;;  %v198_v24 = vld [vmem:[%s1164_s19 + $0xd8] sm:$0xff] }
  0x16   : > { %961 = vmatprep.mubr.msk.f32.mxu1 %vm211_vm1, %v191_v10  ;;  %v183_v25 = vld [vmem:[%s1164_s19 + $0x60] sm:$0xff]  ;;  %v184_v27 = vld [vmem:[%s1164_s19 + $0x68] sm:$0xff]  ;;  %v185_v29 = vld [vmem:[%s1164_s19 + $0x70] sm:$0xff] }
  0x17   : > { %v199_v26 = vld [vmem:[%s1164_s19 + $0xe0] sm:$0xff]  ;;  %v200_v28 = vld [vmem:[%s1164_s19 + $0xe8] sm:$0xff]  ;;  %v201_v30 = vld [vmem:[%s1164_s19 + $0xf0] sm:$0xff] }
  0x18   : > { %938 = vmatmul.mubr.msk.f32.gmra.mxu0 %vm211_vm1, %v176_v11  ;;  %v186_v31 = vld [vmem:[%s1164_s19 + $0x78] sm:$0xff] }
  0x19   : > { %962 = vmatmul.mubr.msk.f32.gmra.mxu1 %vm211_vm1, %v192_v12  ;;  %940 = vmatprep.mubr.msk.f32.mxu0 %vm211_vm1, %v177_v13  ;;  %v202_v32 = vld [vmem:[%s1164_s19 + $0xf8] sm:$0xff] }
  0x1a   : > { %964 = vmatprep.mubr.msk.f32.mxu1 %vm211_vm1, %v193_v14 }
  0x1c   : > { %941 = vmatmul.mubr.msk.f32.gmra.mxu0 %vm211_vm1, %v178_v15 }
  0x1d   : > { %965 = vmatmul.mubr.msk.f32.gmra.mxu1 %vm211_vm1, %v194_v16  ;;  %943 = vmatprep.mubr.msk.f32.mxu0 %vm211_vm1, %v179_v17 }
  0x1e   : > { %967 = vmatprep.mubr.msk.f32.mxu1 %vm211_vm1, %v195_v18 }
  0x20   : > { %944 = vmatmul.mubr.msk.f32.gmra.mxu0 %vm211_vm1, %v180_v19 }
  0x21   : > { %968 = vmatmul.mubr.msk.f32.gmra.mxu1 %vm211_vm1, %v196_v20  ;;  %946 = vmatprep.mubr.msk.f32.mxu0 %vm211_vm1, %v181_v21 }
  0x22   : > { %970 = vmatprep.mubr.msk.f32.mxu1 %vm211_vm1, %v197_v22 }
  0x24   : > { %947 = vmatmul.mubr.msk.f32.gmra.mxu0 %vm211_vm1, %v182_v23 }
  0x25   : > { %971 = vmatmul.mubr.msk.f32.gmra.mxu1 %vm211_vm1, %v198_v24  ;;  %949 = vmatprep.mubr.msk.f32.mxu0 %vm211_vm1, %v183_v25 }
  0x26   : > { %973 = vmatprep.mubr.msk.f32.mxu1 %vm211_vm1, %v199_v26 }
  0x28   : > { %950 = vmatmul.mubr.msk.f32.gmra.mxu0 %vm211_vm1, %v184_v27 }
  0x29   : > { %974 = vmatmul.mubr.msk.f32.gmra.mxu1 %vm211_vm1, %v200_v28  ;;  %952 = vmatprep.mubr.msk.f32.mxu0 %vm211_vm1, %v185_v29 }
  0x2a   : > { %976 = vmatprep.mubr.msk.f32.mxu1 %vm211_vm1, %v201_v30 }
  0x2c   : > { %953 = vmatmul.mubr.msk.f32.gmra.mxu0 %vm211_vm1, %v186_v31 }
  0x2d   : > { %977 = vmatmul.mubr.msk.f32.gmra.mxu1 %vm211_vm1, %v202_v32 }
  0xd0   : > { %v933_v34 = vpop.f32.mrf.mxu0 }
  0xd1   : > { %v957_v35 = vpop.f32.mrf.mxu1  ;;  %v1236_v36 = vadd.f32 %v933_v34, %v1233_v33 }
  0xd2   : > { %v1239_v37 = vadd.f32 %v957_v35, %v1233_v33  ;;  %v378_v38 = vpop.f32.mrf.mxu0 }
  0xd3   : > { %v458_v39 = vpop.f32.mrf.mxu1  ;;  %v538_v40 = vsub.f32 0.0, %v1236_v36  ;;  %v1244_v42 = vadd.f32 %v1233_v33, %v378_v38 }
  0xd4   : > { %v554_v41 = vsub.f32 0.0, %v1239_v37  ;;  %v1247_v43 = vadd.f32 %v1233_v33, %v458_v39  ;;  %v936_v44 = vpop.f32.mrf.mxu0 }
  0xd5   : > { %v960_v45 = vpop.f32.mrf.mxu1  ;;  %v571_v46 = vmul.f32 1.442695, %v538_v40  ;;  %v537_v48 = vsub.f32 0.0, %v1244_v42  ;;  %v1252_v50 = vadd.f32 %v936_v44, %v1233_v33 }
  0xd6   : > { %v603_v47 = vmul.f32 1.442695, %v554_v41  ;;  %v553_v49 = vsub.f32 0.0, %v1247_v43  ;;  %v1255_v51 = vadd.f32 %v960_v45, %v1233_v33  ;;  %v388_v52 = vpop.f32.mrf.mxu0 }
  0xd7   : > { %v468_v53 = vpop.f32.mrf.mxu1  ;;  %989 = vpow2.f32 %v571_v46  ;;  %v569_v54 = vmul.f32 1.442695, %v537_v48  ;;  %v1258_v56 = vadd.f32 %v1233_v33, %v388_v52  ;;  %v540_v57 = vsub.f32 0.0, %v1252_v50 }
  0xd8   : > { %v601_v55 = vmul.f32 1.442695, %v553_v49  ;;  %991 = vpow2.f32 %v603_v47  ;;  %v556_v58 = vsub.f32 0.0, %v1255_v51  ;;  %v1263_v59 = vadd.f32 %v1233_v33, %v468_v53  ;;  %v939_v60 = vpop.f32.mrf.mxu0 }
  0xd9   : > { %v963_v61 = vpop.f32.mrf.mxu1  ;;  %993 = vpow2.f32 %v569_v54  ;;  %v539_v62 = vsub.f32 0.0, %v1258_v56  ;;  %v1267_v63 = vadd.f32 %v939_v60, %v1233_v33  ;;  %v575_v1 = vmul.f32 1.442695, %v540_v57 }
  0xda   : > { %v1270_v0 = vadd.f32 %v963_v61, %v1233_v33  ;;  %995 = vpow2.f32 %v601_v55  ;;  %v607_v2 = vmul.f32 1.442695, %v556_v58  ;;  %v555_v3 = vsub.f32 0.0, %v1263_v59  ;;  %v398_v4 = vpop.f32.mrf.mxu0 }
  0xdb   : > { %v478_v5 = vpop.f32.mrf.mxu1  ;;  %v573_v6 = vmul.f32 1.442695, %v539_v62  ;;  %v542_v7 = vsub.f32 0.0, %v1267_v63  ;;  %v1276_v9 = vadd.f32 %v1233_v33, %v398_v4  ;;  %997 = vpow2.f32 %v575_v1 }
  0xdc   : > { %v558_v8 = vsub.f32 0.0, %v1270_v0  ;;  %v605_v10 = vmul.f32 1.442695, %v555_v3  ;;  %v1279_v11 = vadd.f32 %v1233_v33, %v478_v5  ;;  %v942_v12 = vpop.f32.mrf.mxu0  ;;  %999 = vpow2.f32 %v607_v2 }
  0xdd   : > { %v966_v13 = vpop.f32.mrf.mxu1  ;;  %v579_v14 = vmul.f32 1.442695, %v542_v7  ;;  %v541_v16 = vsub.f32 0.0, %v1276_v9  ;;  %1001 = vpow2.f32 %v573_v6  ;;  %v1284_v18 = vadd.f32 %v942_v12, %v1233_v33 }
  0xde   : > { %v611_v15 = vmul.f32 1.442695, %v558_v8  ;;  %v557_v17 = vsub.f32 0.0, %v1279_v11  ;;  %v1287_v19 = vadd.f32 %v966_v13, %v1233_v33  ;;  %v408_v20 = vpop.f32.mrf.mxu0  ;;  %1003 = vpow2.f32 %v605_v10 }
  0xdf   : > { %v488_v21 = vpop.f32.mrf.mxu1  ;;  %v577_v22 = vmul.f32 1.442695, %v541_v16  ;;  %v1290_v23 = vadd.f32 %v1233_v33, %v408_v20  ;;  %1005 = vpow2.f32 %v579_v14  ;;  %v544_v26 = vsub.f32 0.0, %v1284_v18 }
  0xe0   : > { %v1293_v24 = vadd.f32 %v1233_v33, %v488_v21  ;;  %v609_v25 = vmul.f32 1.442695, %v557_v17  ;;  %v560_v27 = vsub.f32 0.0, %v1287_v19  ;;  %v945_v28 = vpop.f32.mrf.mxu0  ;;  %1007 = vpow2.f32 %v611_v15 }
  0xe1   : > { %v969_v29 = vpop.f32.mrf.mxu1  ;;  %v543_v30 = vsub.f32 0.0, %v1290_v23  ;;  %1009 = vpow2.f32 %v577_v22  ;;  %v583_v31 = vmul.f32 1.442695, %v544_v26  ;;  %v1300_v57 = vadd.f32 %v945_v28, %v1233_v33 }
  0xe2   : > { %v615_v32 = vmul.f32 1.442695, %v560_v27  ;;  %v418_v34 = vpop.f32.mrf.mxu0  ;;  %1011 = vpow2.f32 %v609_v25  ;;  %v559_v39 = vsub.f32 0.0, %v1293_v24  ;;  %v1303_v60 = vadd.f32 %v969_v29, %v1233_v33 }
  0xe3   : > { %v498_v35 = vpop.f32.mrf.mxu1  ;;  %v581_v38 = vmul.f32 1.442695, %v543_v30  ;;  %1013 = vpow2.f32 %v583_v31  ;;  %v1306_v1 = vadd.f32 %v1233_v33, %v418_v34  ;;  %v546_v10 = vsub.f32 0.0, %v1300_v57 }
  0xe4   : > { %v990_v40 = vpop.eup %989  ;;  %v948_v41 = vpop.f32.mrf.mxu0  ;;  %1015 = vpow2.f32 %v615_v32  ;;  %v613_v53 = vmul.f32 1.442695, %v559_v39  ;;  %v1309_v5 = vadd.f32 %v1233_v33, %v498_v35  ;;  %v562_v15 = vsub.f32 0.0, %v1303_v60 }
  0xe5   : > { %v992_v44 = vpop.eup %991  ;;  %v634_v45 = vadd.f32 1.0, %v990_v40  ;;  %1017 = vpow2.f32 %v581_v38  ;;  %v972_v48 = vpop.f32.mrf.mxu1  ;;  %v1313_v12 = vadd.f32 %v948_v41, %v1233_v33  ;;  %v545_v21 = vsub.f32 0.0, %v1306_v1 }
  0xe6   : > { %v994_v46 = vpop.eup %993  ;;  %v650_v47 = vadd.f32 1.0, %v992_v44  ;;  %v428_v54 = vpop.f32.mrf.mxu0  ;;  %v1317_v16 = vadd.f32 %v972_v48, %v1233_v33  ;;  %v561_v27 = vsub.f32 0.0, %v1309_v5  ;;  %v587_v32 = vmul.f32 1.442695, %v546_v10 }
  0xe7   : > { %v996_v49 = vpop.eup %995  ;;  %1019 = vrcp.f32 %v634_v45  ;;  %v633_v52 = vadd.f32 1.0, %v994_v46  ;;  %v508_v2 = vpop.f32.mrf.mxu1  ;;  %v1322_v28 = vadd.f32 %v1233_v33, %v428_v54  ;;  %v548_v34 = vsub.f32 0.0, %v1313_v12 }
  0xe8   : > { %1021 = vrcp.f32 %v650_v47  ;;  %v649_v55 = vadd.f32 1.0, %v996_v49  ;;  %v998_v58 = vpop.eup %997  ;;  %v951_v6 = vpop.f32.mrf.mxu0  ;;  %v619_v39 = vmul.f32 1.442695, %v562_v15  ;;  %v564_v40 = vsub.f32 0.0, %v1317_v16 }
  0xe9   : > { %1023 = vrcp.f32 %v633_v52  ;;  %v1000_v61 = vpop.eup %999  ;;  %v636_v62 = vadd.f32 1.0, %v998_v58  ;;  %v975_v22 = vpop.f32.mrf.mxu1  ;;  %v585_v45 = vmul.f32 1.442695, %v545_v21  ;;  %v1327_v46 = vadd.f32 %v1233_v33, %v508_v2 }
  0xea   : > { %1025 = vrcp.f32 %v649_v55  ;;  %v1002_v3 = vpop.eup %1001  ;;  %v652_v4 = vadd.f32 1.0, %v1000_v61  ;;  %v438_v29 = vpop.f32.mrf.mxu0  ;;  %v617_v52 = vmul.f32 1.442695, %v561_v27  ;;  %v591_v61 = vmul.f32 1.442695, %v548_v34 }
  0xeb   : > { %1027 = vpow2.f32 %v613_v53  ;;  %v1004_v7 = vpop.eup %1003  ;;  %v635_v8 = vadd.f32 1.0, %v1002_v3  ;;  %v518_v47 = vpop.f32.mrf.mxu1  ;;  %v547_v53 = vsub.f32 0.0, %v1322_v28 }
  0xec   : > { %1029 = vrcp.f32 %v636_v62  ;;  %v1006_v13 = vpop.eup %1005  ;;  %v651_v14 = vadd.f32 1.0, %v1004_v7  ;;  %v954_v54 = vpop.f32.mrf.mxu0  ;;  %v1338_v62 = vadd.f32 %v951_v6, %v1233_v33  ;;  %v1342_v7 = vadd.f32 %v975_v22, %v1233_v33 }
  0xed   : > { %1031 = vrcp.f32 %v652_v4  ;;  %v1008_v17 = vpop.eup %1007  ;;  %v638_v20 = vadd.f32 1.0, %v1006_v13  ;;  %v623_v4 = vmul.f32 1.442695, %v564_v40  ;;  %v563_v13 = vsub.f32 0.0, %v1327_v46  ;;  %v978_v6 = vpop.f32.mrf.mxu1 }
  0xee   : > { %1033 = vrcp.f32 %v635_v8  ;;  %v1010_v25 = vpop.eup %1009  ;;  %v654_v26 = vadd.f32 1.0, %v1008_v17  ;;  %v589_v17 = vmul.f32 1.442695, %v547_v53 }
  0xef   : > { %1035 = vrcp.f32 %v651_v14  ;;  %v1012_v30 = vpop.eup %1011  ;;  %v637_v31 = vadd.f32 1.0, %v1010_v25  ;;  %v1347_v14 = vadd.f32 %v1233_v33, %v438_v29  ;;  %v550_v25 = vsub.f32 0.0, %v1338_v62 }
  0xf0   : > { %1037 = vrcp.f32 %v638_v20  ;;  %v1014_v35 = vpop.eup %1013  ;;  %v653_v38 = vadd.f32 1.0, %v1012_v30  ;;  %v1353_v20 = vadd.f32 %v1233_v33, %v518_v47  ;;  %v566_v29 = vsub.f32 0.0, %v1342_v7  ;;  %v528_v47 = vpop.f32.mrf.mxu1 }
  0xf1   : > { %1039 = vrcp.f32 %v654_v26  ;;  %v1016_v41 = vpop.eup %1015  ;;  %v640_v44 = vadd.f32 1.0, %v1014_v35  ;;  %v1360_v26 = vadd.f32 %v954_v54, %v1233_v33  ;;  %v1366_v30 = vadd.f32 %v978_v6, %v1233_v33 }
  0xf2   : > { %1041 = vrcp.f32 %v637_v31  ;;  %v1018_v48 = vpop.eup %1017  ;;  %v656_v49 = vadd.f32 1.0, %v1016_v41  ;;  %v565_v40 = vsub.f32 0.0, %v1353_v20 }
  0xf3   : > { %1043 = vrcp.f32 %v653_v38  ;;  %v639_v58 = vadd.f32 1.0, %v1018_v48 }
  0xf4   : > { %v1020_v55 = vpop.eup %1019  ;;  %1045 = vrcp.f32 %v640_v44  ;;  %v595_v44 = vmul.f32 1.442695, %v550_v25 }
  0xf5   : > { %v1022_v2 = vpop.eup %1021  ;;  %v730_v3 = vmul.f32 %v1020_v55, %v1236_v36  ;;  %1047 = vrcp.f32 %v656_v49  ;;  %v627_v49 = vmul.f32 1.442695, %v566_v29 }
  0xf6   : > { %v1024_v8 = vpop.eup %1023  ;;  %v746_v10 = vmul.f32 %v1022_v2, %v1239_v37  ;;  %1049 = vrcp.f32 %v639_v58  ;;  %v448_v37 = vpop.f32.mrf.mxu0  ;;  %v1393_v2 = vadd.f32 %v1233_v33, %v528_v47 }
  0xf7   : > { %v1026_v15 = vpop.eup %1025  ;;  %763 = vst.msk [vmem:[%s1335_s24 + $0x8] sm:$0xff] %vm761_vm2, %v730_v3  ;;  %v729_v36 = vmul.f32 %v1024_v8, %v1244_v42  ;;  %1051 = vpow2.f32 %v587_v32  ;;  %v549_v32 = vsub.f32 0.0, %v1347_v14  ;;  %v1373_v34 = vadd.f32 %v1233_v33, %v448_v37 }
  0xf8   : > { %v1028_v21 = vpop.eup %1027  ;;  %779 = vst.msk [vmem:[%s1335_s24 + $0x88] sm:$0xff] %vm761_vm2, %v746_v10  ;;  %v745_v22 = vmul.f32 %v1026_v15, %v1247_v43  ;;  %1053 = vpow2.f32 %v619_v39  ;;  %v621_v39 = vmul.f32 1.442695, %v563_v13 }
  0xf9   : > { %v1030_v27 = vpop.eup %1029  ;;  %762 = vst.msk [vmem:[%s1335_s24] sm:$0xff] %vm761_vm2, %v729_v36  ;;  %v655_v42 = vadd.f32 1.0, %v1028_v21  ;;  %1055 = vpow2.f32 %v585_v45  ;;  %v552_v45 = vsub.f32 0.0, %v1360_v26  ;;  %v593_v54 = vmul.f32 1.442695, %v549_v32 }
  0xfa   : > { %v1032_v31 = vpop.eup %1031  ;;  %778 = vst.msk [vmem:[%s1335_s24 + $0x80] sm:$0xff] %vm761_vm2, %v745_v22  ;;  %v732_v43 = vmul.f32 %v1030_v27, %v1252_v50  ;;  %1057 = vpow2.f32 %v617_v52  ;;  %v568_v52 = vsub.f32 0.0, %v1366_v30  ;;  %v551_v55 = vsub.f32 0.0, %v1373_v34 }
  0xfb   : > { %v1034_v35 = vpop.eup %1033  ;;  %v748_v38 = vmul.f32 %v1032_v31, %v1255_v51  ;;  %1059 = vrcp.f32 %v655_v42  ;;  %v567_v36 = vsub.f32 0.0, %v1393_v2 }
  0xfc   : > { %v1036_v41 = vpop.eup %1035  ;;  %765 = vst.msk [vmem:[%s1335_s24 + $0x18] sm:$0xff] %vm761_vm2, %v732_v43  ;;  %v731_v50 = vmul.f32 %v1034_v35, %v1258_v56  ;;  %1061 = vpow2.f32 %v591_v61  ;;  %v625_v61 = vmul.f32 1.442695, %v565_v40  ;;  %v597_v6 = vmul.f32 1.442695, %v551_v55 }
  0xfd   : > { %v1038_v48 = vpop.eup %1037  ;;  %781 = vst.msk [vmem:[%s1335_s24 + $0x98] sm:$0xff] %vm761_vm2, %v748_v38  ;;  %v747_v51 = vmul.f32 %v1036_v41, %v1263_v59  ;;  %1063 = vpow2.f32 %v623_v4  ;;  %v599_v4 = vmul.f32 1.442695, %v552_v45  ;;  %v629_v27 = vmul.f32 1.442695, %v567_v36 }
  0xfe   : > { %v1040_v53 = vpop.eup %1039  ;;  %764 = vst.msk [vmem:[%s1335_s24 + $0x10] sm:$0xff] %vm761_vm2, %v731_v50  ;;  %v734_v56 = vmul.f32 %v1038_v48, %v1267_v63  ;;  %1065 = vpow2.f32 %v589_v17 }
  0xff   : > { %v1042_v58 = vpop.eup %1041  ;;  %780 = vst.msk [vmem:[%s1335_s24 + $0x90] sm:$0xff] %vm761_vm2, %v747_v51  ;;  %v750_v59 = vmul.f32 %v1040_v53, %v1270_v0  ;;  %1067 = vpow2.f32 %v621_v39  ;;  %v631_v0 = vmul.f32 1.442695, %v568_v52 }
 0x100   : > { %v1044_v3 = vpop.eup %1043  ;;  %767 = vst.msk [vmem:[%s1335_s24 + $0x28] sm:$0xff] %vm761_vm2, %v734_v56  ;;  %v733_v63 = vmul.f32 %v1042_v58, %v1276_v9  ;;  %1069 = vpow2.f32 %v595_v44 }
 0x101   : > { %v1046_v8 = vpop.eup %1045  ;;  %783 = vst.msk [vmem:[%s1335_s24 + $0xa8] sm:$0xff] %vm761_vm2, %v750_v59  ;;  %v749_v10 = vmul.f32 %v1044_v3, %v1279_v11  ;;  %1071 = vpow2.f32 %v627_v49 }
 0x102   : > { %v1048_v13 = vpop.eup %1047  ;;  %766 = vst.msk [vmem:[%s1335_s24 + $0x20] sm:$0xff] %vm761_vm2, %v733_v63  ;;  %v736_v33 = vmul.f32 %v1046_v8, %v1284_v18  ;;  %1073 = vpow2.f32 %v593_v54 }
 0x103   : > { %v1050_v9 = vpop.eup %1049  ;;  %782 = vst.msk [vmem:[%s1335_s24 + $0xa0] sm:$0xff] %vm761_vm2, %v749_v10  ;;  %v752_v15 = vmul.f32 %v1048_v13, %v1287_v19  ;;  %1075 = vpow2.f32 %v625_v61 }
 0x104   : > { %v1052_v11 = vpop.eup %1051  ;;  %769 = vst.msk [vmem:[%s1335_s24 + $0x38] sm:$0xff] %vm761_vm2, %v736_v33  ;;  %v735_v17 = vmul.f32 %v1050_v9, %v1290_v23  ;;  %1077 = vpow2.f32 %v599_v4 }
 0x105   : > { %v1054_v37 = vpop.eup %1053  ;;  %785 = vst.msk [vmem:[%s1335_s24 + $0xb8] sm:$0xff] %vm761_vm2, %v752_v15  ;;  %v642_v18 = vadd.f32 1.0, %v1052_v11  ;;  %1079 = vpow2.f32 %v631_v0 }
 0x106   : > { %v1056_v21 = vpop.eup %1055  ;;  %768 = vst.msk [vmem:[%s1335_s24 + $0x30] sm:$0xff] %vm761_vm2, %v735_v17  ;;  %v658_v22 = vadd.f32 1.0, %v1054_v37  ;;  %1081 = vpow2.f32 %v597_v6 }
 0x107   : > { %v1058_v19 = vpop.eup %1057  ;;  %1083 = vrcp.f32 %v642_v18  ;;  %v641_v25 = vadd.f32 1.0, %v1056_v21 }
 0x108   : > { %v1060_v42 = vpop.eup %1059  ;;  %1085 = vrcp.f32 %v658_v22  ;;  %v657_v29 = vadd.f32 1.0, %v1058_v19 }
 0x109   : > { %v1062_v23 = vpop.eup %1061  ;;  %v751_v31 = vmul.f32 %v1060_v42, %v1293_v24  ;;  %1087 = vrcp.f32 %v641_v25 }
 0x10a   : > { %v1064_v43 = vpop.eup %1063  ;;  %1089 = vrcp.f32 %v657_v29  ;;  %v644_v32 = vadd.f32 1.0, %v1062_v23 }
 0x10b   : > { %v1066_v35 = vpop.eup %1065  ;;  %784 = vst.msk [vmem:[%s1335_s24 + $0xb0] sm:$0xff] %vm761_vm2, %v751_v31  ;;  %v660_v38 = vadd.f32 1.0, %v1064_v43  ;;  %1091 = vpow2.f32 %v629_v27 }
 0x10c   : > { %v1068_v39 = vpop.eup %1067  ;;  %1093 = vrcp.f32 %v644_v32  ;;  %v643_v40 = vadd.f32 1.0, %v1066_v35 }
 0x10d   : > { %v1070_v41 = vpop.eup %1069  ;;  %1095 = vrcp.f32 %v660_v38  ;;  %v659_v50 = vadd.f32 1.0, %v1068_v39 }
 0x10e   : > { %v1072_v44 = vpop.eup %1071  ;;  %1097 = vrcp.f32 %v643_v40  ;;  %v646_v45 = vadd.f32 1.0, %v1070_v41 }
 0x10f   : > { %v1074_v47 = vpop.eup %1073  ;;  %1099 = vrcp.f32 %v659_v50  ;;  %v662_v24 = vadd.f32 1.0, %v1072_v44 }
 0x110   : > { %v1076_v48 = vpop.eup %1075  ;;  %1101 = vrcp.f32 %v646_v45  ;;  %v645_v51 = vadd.f32 1.0, %v1074_v47 }
 0x111   : > { %v1078_v49 = vpop.eup %1077  ;;  %1103 = vrcp.f32 %v662_v24  ;;  %v661_v52 = vadd.f32 1.0, %v1076_v48 }
 0x112   : > { %v1080_v53 = vpop.eup %1079  ;;  %1105 = vrcp.f32 %v645_v51  ;;  %v648_v56 = vadd.f32 1.0, %v1078_v49 }
 0x113   : > { %v1082_v54 = vpop.eup %1081  ;;  %1107 = vrcp.f32 %v661_v52  ;;  %v664_v55 = vadd.f32 1.0, %v1080_v53 }
 0x114   : > { %v1084_v58 = vpop.eup %1083  ;;  %1109 = vrcp.f32 %v648_v56  ;;  %v647_v59 = vadd.f32 1.0, %v1082_v54 }
 0x115   : > { %v1086_v61 = vpop.eup %1085  ;;  %v738_v3 = vmul.f32 %v1084_v58, %v1300_v57  ;;  %1111 = vrcp.f32 %v664_v55 }
 0x116   : > { %v1088_v63 = vpop.eup %1087  ;;  %v754_v4 = vmul.f32 %v1086_v61, %v1303_v60  ;;  %1113 = vrcp.f32 %v647_v59 }
 0x117   : > { %v1090_v8 = vpop.eup %1089  ;;  %771 = vst.msk [vmem:[%s1335_s24 + $0x48] sm:$0xff] %vm761_vm2, %v738_v3  ;;  %v737_v10 = vmul.f32 %v1088_v63, %v1306_v1 }
 0x118   : > { %v1092_v0 = vpop.eup %1091  ;;  %787 = vst.msk [vmem:[%s1335_s24 + $0xc8] sm:$0xff] %vm761_vm2, %v754_v4  ;;  %v753_v13 = vmul.f32 %v1090_v8, %v1309_v5 }
 0x119   : > { %v1094_v33 = vpop.eup %1093  ;;  %770 = vst.msk [vmem:[%s1335_s24 + $0x40] sm:$0xff] %vm761_vm2, %v737_v10  ;;  %v663_v57 = vadd.f32 1.0, %v1092_v0 }
 0x11a   : > { %v1096_v6 = vpop.eup %1095  ;;  %786 = vst.msk [vmem:[%s1335_s24 + $0xc0] sm:$0xff] %vm761_vm2, %v753_v13  ;;  %v740_v60 = vmul.f32 %v1094_v33, %v1313_v12 }
 0x11b   : > { %v1098_v9 = vpop.eup %1097  ;;  %v756_v1 = vmul.f32 %v1096_v6, %v1317_v16  ;;  %1115 = vrcp.f32 %v663_v57 }
 0x11c   : > { %v1100_v15 = vpop.eup %1099  ;;  %773 = vst.msk [vmem:[%s1335_s24 + $0x58] sm:$0xff] %vm761_vm2, %v740_v60  ;;  %v739_v5 = vmul.f32 %v1098_v9, %v1322_v28 }
 0x11d   : > { %v1102_v36 = vpop.eup %1101  ;;  %789 = vst.msk [vmem:[%s1335_s24 + $0xd8] sm:$0xff] %vm761_vm2, %v756_v1  ;;  %v755_v11 = vmul.f32 %v1100_v15, %v1327_v46 }
 0x11e   : > { %v1104_v17 = vpop.eup %1103  ;;  %772 = vst.msk [vmem:[%s1335_s24 + $0x50] sm:$0xff] %vm761_vm2, %v739_v5  ;;  %v742_v12 = vmul.f32 %v1102_v36, %v1338_v62 }
 0x11f   : > { %v1106_v16 = vpop.eup %1105  ;;  %788 = vst.msk [vmem:[%s1335_s24 + $0xd0] sm:$0xff] %vm761_vm2, %v755_v11  ;;  %v758_v37 = vmul.f32 %v1104_v17, %v1342_v7 }
 0x120   : > { %v1108_v28 = vpop.eup %1107  ;;  %775 = vst.msk [vmem:[%s1335_s24 + $0x68] sm:$0xff] %vm761_vm2, %v742_v12  ;;  %v741_v18 = vmul.f32 %v1106_v16, %v1347_v14 }
 0x121   : > { %v1110_v46 = vpop.eup %1109  ;;  %791 = vst.msk [vmem:[%s1335_s24 + $0xe8] sm:$0xff] %vm761_vm2, %v758_v37  ;;  %v757_v21 = vmul.f32 %v1108_v28, %v1353_v20 }
 0x122   : > { %v1112_v62 = vpop.eup %1111  ;;  %774 = vst.msk [vmem:[%s1335_s24 + $0x60] sm:$0xff] %vm761_vm2, %v741_v18  ;;  %v744_v22 = vmul.f32 %v1110_v46, %v1360_v26 }
 0x123   : > { %v1114_v19 = vpop.eup %1113  ;;  %790 = vst.msk [vmem:[%s1335_s24 + $0xe0] sm:$0xff] %vm761_vm2, %v757_v21  ;;  %v760_v7 = vmul.f32 %v1112_v62, %v1366_v30 }
 0x124   : > { %777 = vst.msk [vmem:[%s1335_s24 + $0x78] sm:$0xff] %vm761_vm2, %v744_v22  ;;  %v743_v14 = vmul.f32 %v1114_v19, %v1373_v34 }
 0x125   : > { %793 = vst.msk [vmem:[%s1335_s24 + $0xf8] sm:$0xff] %vm761_vm2, %v760_v7 }
 0x126   : > { %776 = vst.msk [vmem:[%s1335_s24 + $0x70] sm:$0xff] %vm761_vm2, %v743_v14 }
 0x128   : > { %v1116_v25 = vpop.eup %1115 }
 0x129   : > { %v759_v20 = vmul.f32 %v1116_v25, %v1393_v2 }
 0x12b   : > { %792 = vst.msk [vmem:[%s1335_s24 + $0xf0] sm:$0xff] %vm761_vm2, %v759_v20 }
 0x12c PF: > { %s13_s12 = sadd.s32 1, %s1123_s12  }
 0x12d   : > { %p10_p4 = scmp.ge.s32.totalorder %s13_s12, 4  }
 0x12f   :  { %12 = sbr.rel (!%p10_p4) target bundleno = 1 (0x1), region = 62 }

</bundles_post_ra>
